<compile_context>
chip_gen: v6e
topology: v6e:2x2x1
jax: 0.10.0
libtpu: 0.0.40
codegen_flags: <defaults>
</compile_context>

<pallas_src>
import functools
import math

import jax
import jax.numpy as jnp
from jax import lax
from jax.experimental import pallas as pl
from jax.experimental.pallas import tpu as pltpu

F32 = jnp.float32


def _round_up(x, m):
    return ((x + m - 1) // m) * m


# ----------------------------- fused MLP kernel ------------------------------

def _mlp_kernel(*refs, num_layers):
    """refs = (x_ref, w1_ref, b1_ref, ..., wL_ref, bL_ref, o_ref).

    Batch-minor layout: x_ref is (in_dim, tm); W_l is the native torch layout
    (dout, din); b_l is (dout, 1); output is (out_dim, tm).  The whole layer
    chain runs back-to-back in VMEM for the current batch tile:
        h = relu(W_l @ h + b_l)   for all but the last layer
        o = W_L @ h + b_L
    """
    x_ref = refs[0]
    o_ref = refs[-1]
    h = x_ref[...]
    for l in range(num_layers):
        w_ref = refs[1 + 2 * l]
        b_ref = refs[2 + 2 * l]
        h = jnp.dot(w_ref[...], h, preferred_element_type=jnp.float32) + b_ref[...]
        if l < num_layers - 1:
            h = jnp.maximum(h, 0.0)
    o_ref[...] = h.astype(o_ref.dtype)


def contrastive_head_forward(x, layer_params, *, num_row_blocks=1):
    """Fused ContrastiveHead forward.

    x: (M, in_dim) float32 (PyTorch layout).  Returns (M, out_dim).
    layer_params: list of (W, b) with W in native torch.nn.Linear layout
                  (out_features, in_features), b as (out_features,).
    num_row_blocks: batch tiles across the grid.  1 (default) is best on
      single-TensorCore chips (v5e/v6e); 2 lets v7x shard the batch across
      its two TensorCores when M is large.
    """
    x = x.astype(F32)
    M, in_dim = x.shape
    num_layers = len(layer_params)
    out_dim = layer_params[-1][0].shape[0]

    # Flatten params; biases as (dout, 1) columns (broadcast along lanes).
    flat = []
    for W, b in layer_params:
        flat.append(W.astype(F32))
        flat.append(b.reshape(-1, 1).astype(F32))

    kernel = functools.partial(_mlp_kernel, num_layers=num_layers)

    # One tiny wrapper transpose so the batch is the lane (minor) axis.
    xt = x.T  # (in_dim, M)

    # Batch tiling: a single full-extent block unless explicitly splitting for
    # v7x megacore.  Lane tiles must be multiples of 128; the last block may be
    # ragged (rows are independent, so Pallas' masking of the edge is safe).
    if num_row_blocks <= 1:
        n_blocks = 1
    else:
        tm = _round_up(pl.cdiv(M, num_row_blocks), 128)
        n_blocks = pl.cdiv(M, tm)

    if n_blocks == 1:
        # No grid: x tile, all weights/biases and the output live in VMEM at once.
        out_t = pl.pallas_call(
            kernel,
            out_shape=jax.ShapeDtypeStruct((out_dim, M), F32),
        )(xt, *flat)
    else:
        in_specs = [pl.BlockSpec((in_dim, tm), lambda i: (0, i))]
        for W, b in layer_params:
            dout, din = W.shape
            in_specs.append(pl.BlockSpec((dout, din), lambda i: (0, 0)))   # resident
            in_specs.append(pl.BlockSpec((dout, 1), lambda i: (0, 0)))     # resident
        out_t = pl.pallas_call(
            kernel,
            out_shape=jax.ShapeDtypeStruct((out_dim, M), F32),
            grid=(n_blocks,),
            in_specs=in_specs,
            out_specs=pl.BlockSpec((out_dim, tm), lambda i: (0, i)),
            compiler_params=pltpu.CompilerParams(
                dimension_semantics=("parallel",)),
        )(xt, *flat)

    return out_t.T  # back to (M, out_dim)


# ------------------------------ reference & init -----------------------------

def ref_forward(x, layer_params):
    h = x.astype(F32)
    n = len(layer_params)
    for i, (W, b) in enumerate(layer_params):
        h = jnp.dot(h, W.astype(F32).T, precision=lax.Precision.HIGHEST) + b.astype(F32)
        if i < n - 1:
            h = jnp.maximum(h, 0.0)
    return h


def init_contrastive_head(key, in_dim, hidden_dim, out_dim, num_layers):
    """Mimics torch.nn.Linear default init (uniform(-1/sqrt(fan_in), ...)).

    Weights stored in native torch layout (out_features, in_features).
    """
    dims = [in_dim] + [hidden_dim] * (num_layers - 1) + [out_dim]
    params = []
    for l in range(num_layers):
        din, dout = dims[l], dims[l + 1]
        key, kw, kb = jax.random.split(key, 3)
        bound = 1.0 / math.sqrt(din)
        W = jax.random.uniform(kw, (dout, din), F32, -bound, bound)
        b = jax.random.uniform(kb, (dout,), F32, -bound, bound)
        params.append((W, b))
    return params


# ---------------------------------- main --------------------------------------

if __name__ == "__main__":
    root = jax.random.PRNGKey(0)
    kp, kx1, kx2 = jax.random.split(root, 3)

    IN_DIM, HIDDEN_DIM, OUT_DIM, NUM_LAYERS = 16, 32, 16, 3
    params = init_contrastive_head(kp, IN_DIM, HIDDEN_DIM, OUT_DIM, NUM_LAYERS)

    fwd1 = jax.jit(contrastive_head_forward)                                  # 1 block
    fwd2 = jax.jit(functools.partial(contrastive_head_forward,
                                     num_row_blocks=2))                       # v7x split

    ok = True

    # Case 1: small batch -> single full-extent block (no grid, no pad/slice).
    x_small = jax.random.normal(kx1, (16, IN_DIM), F32)
    y_small = fwd1(x_small, params)
    jax.block_until_ready(y_small)
    ok &= bool(jnp.allclose(y_small, ref_forward(x_small, params),
                            rtol=2e-4, atol=2e-4))

    # Case 2a: larger, non-multiple batch, default single block.
    x_big = jax.random.normal(kx2, (300, IN_DIM), F32)
    y_big = fwd1(x_big, params)
    jax.block_until_ready(y_big)
    ok &= bool(jnp.allclose(y_big, ref_forward(x_big, params),
                            rtol=2e-4, atol=2e-4))

    # Case 2b: same batch, 2-way "parallel" grid with a ragged last block
    # (the path v7x would use to shard across its two TensorCores).
    y_big2 = fwd2(x_big, params)
    jax.block_until_ready(y_big2)
    ok &= bool(jnp.allclose(y_big2, ref_forward(x_big, params),
                            rtol=2e-4, atol=2e-4))

    ok &= (y_small.shape == (16, OUT_DIM)) and (y_big.shape == (300, OUT_DIM)) \
          and (y_big2.shape == (300, OUT_DIM))

    if not ok:
        raise SystemExit("KERNEL_MISMATCH")
    print("KERNEL_OK")
</pallas_src>

<mosaic_0001>
module attributes {stable_mosaic.version = 11 : i64} {
  func.func @_mlp_kernel(%arg0: memref<16x16xf32, #tpu.memory_space<vmem>>, %arg1: memref<32x16xf32, #tpu.memory_space<vmem>>, %arg2: memref<32x1xf32, #tpu.memory_space<vmem>>, %arg3: memref<32x32xf32, #tpu.memory_space<vmem>>, %arg4: memref<32x1xf32, #tpu.memory_space<vmem>>, %arg5: memref<16x32xf32, #tpu.memory_space<vmem>>, %arg6: memref<16x1xf32, #tpu.memory_space<vmem>>, %arg7: memref<16x16xf32, #tpu.memory_space<vmem>>) attributes {dimension_semantics = [], scalar_prefetch = 0 : i64, scratch_operands = 0 : i64, tpu.core_type = #tpu.core_type<tc>} {
    %c0 = arith.constant 0 : index
    %c0_0 = arith.constant 0 : index
    %0 = vector.load %arg0[%c0, %c0_0] : memref<16x16xf32, #tpu.memory_space<vmem>>, vector<16x16xf32>
    %c0_1 = arith.constant 0 : index
    %c0_2 = arith.constant 0 : index
    %1 = vector.load %arg1[%c0_1, %c0_2] : memref<32x16xf32, #tpu.memory_space<vmem>>, vector<32x16xf32>
    %cst = arith.constant dense<0.000000e+00> : vector<32x16xf32>
    %2 = tpu.matmul %1, %0, %cst {dimension_numbers = #tpu.dot_dimension_numbers<[1], [0], [0], [1], [0, 0, 1, 1], [], []>} : vector<32x16xf32>, vector<16x16xf32>, vector<32x16xf32> -> vector<32x16xf32>
    %c0_3 = arith.constant 0 : index
    %c0_4 = arith.constant 0 : index
    %3 = vector.load %arg2[%c0_3, %c0_4] : memref<32x1xf32, #tpu.memory_space<vmem>>, vector<32x1xf32>
    %4 = vector.broadcast %3 : vector<32x1xf32> to vector<32x16xf32>
    %5 = arith.addf %2, %4 : vector<32x16xf32>
    %cst_5 = arith.constant 0.000000e+00 : f32
    %6 = vector.broadcast %cst_5 : f32 to vector<32x16xf32>
    %7 = arith.maximumf %5, %6 : vector<32x16xf32>
    %c0_6 = arith.constant 0 : index
    %c0_7 = arith.constant 0 : index
    %8 = vector.load %arg3[%c0_6, %c0_7] : memref<32x32xf32, #tpu.memory_space<vmem>>, vector<32x32xf32>
    %cst_8 = arith.constant dense<0.000000e+00> : vector<32x16xf32>
    %9 = tpu.matmul %8, %7, %cst_8 {dimension_numbers = #tpu.dot_dimension_numbers<[1], [0], [0], [1], [0, 0, 1, 1], [], []>} : vector<32x32xf32>, vector<32x16xf32>, vector<32x16xf32> -> vector<32x16xf32>
    %c0_9 = arith.constant 0 : index
    %c0_10 = arith.constant 0 : index
    %10 = vector.load %arg4[%c0_9, %c0_10] : memref<32x1xf32, #tpu.memory_space<vmem>>, vector<32x1xf32>
    %11 = vector.broadcast %10 : vector<32x1xf32> to vector<32x16xf32>
    %12 = arith.addf %9, %11 : vector<32x16xf32>
    %cst_11 = arith.constant 0.000000e+00 : f32
    %13 = vector.broadcast %cst_11 : f32 to vector<32x16xf32>
    %14 = arith.maximumf %12, %13 : vector<32x16xf32>
    %c0_12 = arith.constant 0 : index
    %c0_13 = arith.constant 0 : index
    %15 = vector.load %arg5[%c0_12, %c0_13] : memref<16x32xf32, #tpu.memory_space<vmem>>, vector<16x32xf32>
    %cst_14 = arith.constant dense<0.000000e+00> : vector<16x16xf32>
    %16 = tpu.matmul %15, %14, %cst_14 {dimension_numbers = #tpu.dot_dimension_numbers<[1], [0], [0], [1], [0, 0, 1, 1], [], []>} : vector<16x32xf32>, vector<32x16xf32>, vector<16x16xf32> -> vector<16x16xf32>
    %c0_15 = arith.constant 0 : index
    %c0_16 = arith.constant 0 : index
    %17 = vector.load %arg6[%c0_15, %c0_16] : memref<16x1xf32, #tpu.memory_space<vmem>>, vector<16x1xf32>
    %18 = vector.broadcast %17 : vector<16x1xf32> to vector<16x16xf32>
    %19 = arith.addf %16, %18 : vector<16x16xf32>
    %c0_17 = arith.constant 0 : index
    %c0_18 = arith.constant 0 : index
    %20 = vector.load %arg7[%c0_17, %c0_18] : memref<16x16xf32, #tpu.memory_space<vmem>>, vector<16x16xf32>
    tpu.vector_store %arg7[%c0_17, %c0_18], %19 {strides = array<i32>} : memref<16x16xf32, #tpu.memory_space<vmem>>, vector<16x16xf32>,
    return
  }
}

</mosaic_0001>

<bundles_post_ra>
// kernel: contrastive_head_forward.1
= control target key start
LH: loop header
LB: loop body
LE: loop exit
PB: predicated region body
PF: predicated region fallthrough
CT: control target
= control target key end

     0   :  { %vm56_vm0 = vcmask 130048   ;;  %v457_v3 = vmov 0   ;;  %vm186_vm1 = vcmask 261120   ;;  %s582_s0 = inlined_call_operand.vmem [shape: f32[16,16], index: 0, kind: input, shape index: {}]   ;;  %s583_s1 = inlined_call_operand.vmem [shape: f32[32,16], index: 1, kind: input, shape index: {}]   ;;  %s584_s2 = inlined_call_operand.vmem [shape: f32[32,1], index: 2, kind: input, shape index: {}]   ;;  %s585_s4 = inlined_call_operand.vmem [shape: f32[32,1], index: 4, kind: input, shape index: {}]   ;;  %s586_s6 = inlined_call_operand.vmem [shape: f32[16,1], index: 6, kind: input, shape index: {}]   ;;  %s587_s3 = inlined_call_operand.vmem [shape: f32[32,32], index: 3, kind: input, shape index: {}]   ;;  %s588_s5 = inlined_call_operand.vmem [shape: f32[16,32], index: 5, kind: input, shape index: {}]   ;;  %s589_s7 = inlined_call_operand.vmem [shape: f32[16,16], index: 7, kind: output, shape index: {}]  }
   0x1   :  { %v27_v0 = vld [vmem:[%s582_s0 + $0x8] sm:$0xff]  ;;  %v26_v1 = vld [vmem:[%s582_s0] sm:$0xff]  ;;  %455 = vset.pattern.permute.xlu0 %v457_v3  ;;  %456 = vset.pattern.permute.xlu1 %v457_v3  ;;  %v35_v5 = vld [vmem:[%s584_s2 + $0x18] sm:$0xff] }
   0x2   :  { %v28_v2 = vld [vmem:[%s583_s1] sm:$0xff]  ;;  %419 = vmatprep.subr.mxu0 %v27_v0  ;;  %v29_v4 = vld [vmem:[%s583_s1 + $0x8] sm:$0xff]  ;;  %v30_v7 = vld [vmem:[%s583_s1 + $0x10] sm:$0xff]  ;;  %53 = vperm.xlu0 %455, %v35_v5  }
   0x3   :  { %423 = vmatprep.mubr.msk.f32.mxu0 %vm56_vm0, %v28_v2  ;;  %420 = vmatpush3.msra.mxu0 %v27_v0  ;;  %v33_v6 = vld [vmem:[%s584_s2 + $0x8] sm:$0xff]  ;;  %v34_v8 = vld [vmem:[%s584_s2 + $0x10] sm:$0xff]  ;;  %v32_v9 = vld [vmem:[%s584_s2] sm:$0xff] }
   0x4   :  { %421 = vmatprep.subr.mxu0 %v26_v1  ;;  %43 = vperm.xlu1 %456, %v33_v6   ;;  %v31_v10 = vld [vmem:[%s583_s1 + $0x18] sm:$0xff]  ;;  %v164_v12 = vld [vmem:[%s585_s4 + $0x10] sm:$0xff]  ;;  %v163_v13 = vld [vmem:[%s585_s4 + $0x8] sm:$0xff] }
   0x5   :  { %422 = vmatpush3.msra.mxu0 %v26_v1  ;;  %v165_v11 = vld [vmem:[%s585_s4 + $0x18] sm:$0xff]  ;;  %v162_v14 = vld [vmem:[%s585_s4] sm:$0xff]  ;;  %v291_v16 = vld [vmem:[%s586_s6 + $0x8] sm:$0xff] }
   0x6   :  { %424 = vmatmul.mubr.msk.f32.vlgmr.msra.gmra.mxu0 %vm56_vm0, %v29_v4  ;;  %48 = vperm.xlu0 %455, %v34_v8   ;;  %v290_v15 = vld [vmem:[%s586_s6] sm:$0xff]  ;;  %v159_v34 = vld [vmem:[%s587_s3 + $0x8] sm:$0xff]  ;;  %v160_v35 = vld [vmem:[%s587_s3 + $0x10] sm:$0xff] }
   0x7   :  { %426 = vmatprep.mubr.msk.f32.mxu0 %vm56_vm0, %v30_v7  ;;  %v158_v17 = vld [vmem:[%s587_s3] sm:$0xff]  ;;  %v161_v36 = vld [vmem:[%s587_s3 + $0x18] sm:$0xff]  ;;  %v289_v54 = vld [vmem:[%s588_s5 + $0x8] sm:$0xff] }
   0x8   :  { %38 = vperm.xlu1 %456, %v32_v9   ;;  %437 = vmatprep.mubr.msk.f32.mxu1 %vm186_vm1, %v158_v17  ;;  %v288_v37 = vld [vmem:[%s588_s5] sm:$0xff] }
   0xa   :  { %427 = vmatmul.mubr.msk.f32.gmra.mxu0 %vm56_vm0, %v31_v10  ;;  %183 = vperm.xlu0 %455, %v165_v11  }
   0xb   :  { %451 = vmatprep.mubr.msk.f32.mxu0 %vm186_vm1, %v288_v37 }
   0xc   :  { %178 = vperm.xlu1 %456, %v164_v12  }
   0xe   :  { %173 = vperm.xlu0 %455, %v163_v13  }
  0x10   :  { %168 = vperm.xlu1 %456, %v162_v14  }
  0x12   :  { %294 = vperm.xlu0 %455, %v290_v15  }
  0x14   :  { %299 = vperm.xlu1 %456, %v291_v16  }
  0x7d   :  { %v54_v18 = vpop.permute.xlu0 %53 }
  0x7f   :  { %v44_v20 = vpop.permute.xlu1 %43 }
  0x81   :  { %v49_v24 = vpop.permute.xlu0 %48 }
  0x83   :  { %v39_v29 = vpop.permute.xlu1 %38 }
  0x85   :  { %v184_v38 = vpop.permute.xlu0 %183 }
  0x87   :  { %v179_v40 = vpop.permute.xlu1 %178 }
  0x89   :  { %v174_v44 = vpop.permute.xlu0 %173 }
  0x8b   :  { %v169_v49 = vpop.permute.xlu1 %168 }
  0x8d   :  { %v295_v58 = vpop.permute.xlu0 %294 }
  0x8f   :  { %v300_v55 = vpop.permute.xlu1 %299 }
  0xc6   :  { %v425_v19 = vpop.f32.mrf.mxu0 }
  0xc7   :  { %v141_v26 = vadd.f32 %v425_v19, %v44_v20 }
  0xc8   :  { %v135_v21 = vpop.f32.mrf.mxu0 }
  0xc9   :  { %v136_v30 = vadd.f32 %v135_v21, %v39_v29  ;;  %v155_v32 = vmax.f32 %v141_v26, 0.0 }
  0xca   :  { %v428_v22 = vpop.f32.mrf.mxu0 }
  0xcb   :  { %v151_v23 = vadd.f32 %v428_v22, %v54_v18  ;;  %v154_v33 = vmax.f32 %v136_v30, 0.0 }
  0xcc   :  { %v145_v25 = vpop.f32.mrf.mxu0 }
  0xcd   :  { %v157_v27 = vmax.f32 %v151_v23, 0.0  ;;  %v146_v28 = vadd.f32 %v145_v25, %v49_v24 }
  0xcf   :  { %v156_v31 = vmax.f32 %v146_v28, 0.0  ;;  %429 = vmatprep.subr.mxu1 %v157_v27 }
  0xd0   :  { %430 = vmatpush3.msra.mxu1 %v157_v27 }
  0xd1   :  { %431 = vmatprep.subr.mxu1 %v156_v31 }
  0xd2   :  { %432 = vmatpush3.msra.mxu1 %v156_v31 }
  0xd3   :  { %433 = vmatprep.subr.mxu1 %v155_v32 }
  0xd4   :  { %434 = vmatpush3.msra.mxu1 %v155_v32 }
  0xd5   :  { %435 = vmatprep.subr.mxu1 %v154_v33 }
  0xd6   :  { %436 = vmatpush3.msra.mxu1 %v154_v33 }
  0xd7   :  { %438 = vmatmul.mubr.msk.f32.vlgmr.msra.gmra.mxu1 %vm186_vm1, %v159_v34 }
  0xd8   :  { %440 = vmatprep.mubr.msk.f32.mxu1 %vm186_vm1, %v160_v35 }
  0xdb   :  { %441 = vmatmul.mubr.msk.f32.gmra.mxu1 %vm186_vm1, %v161_v36 }
 0x197   :  { %v439_v39 = vpop.f32.mrf.mxu1 }
 0x198   :  { %v271_v46 = vadd.f32 %v439_v39, %v174_v44 }
 0x199   :  { %v265_v41 = vpop.f32.mrf.mxu1 }
 0x19a   :  { %v266_v50 = vadd.f32 %v265_v41, %v169_v49  ;;  %v285_v52 = vmax.f32 %v271_v46, 0.0 }
 0x19b   :  { %v442_v42 = vpop.f32.mrf.mxu1 }
 0x19c   :  { %v281_v43 = vadd.f32 %v442_v42, %v184_v38  ;;  %v284_v53 = vmax.f32 %v266_v50, 0.0 }
 0x19d   :  { %v275_v45 = vpop.f32.mrf.mxu1 }
 0x19e   :  { %v287_v47 = vmax.f32 %v281_v43, 0.0  ;;  %v276_v48 = vadd.f32 %v275_v45, %v179_v40 }
 0x1a0   :  { %v286_v51 = vmax.f32 %v276_v48, 0.0  ;;  %443 = vmatprep.subr.mxu0 %v287_v47 }
 0x1a1   :  { %444 = vmatpush3.msra.mxu0 %v287_v47 }
 0x1a2   :  { %445 = vmatprep.subr.mxu0 %v286_v51 }
 0x1a3   :  { %446 = vmatpush3.msra.mxu0 %v286_v51 }
 0x1a4   :  { %447 = vmatprep.subr.mxu0 %v285_v52 }
 0x1a5   :  { %448 = vmatpush3.msra.mxu0 %v285_v52 }
 0x1a6   :  { %449 = vmatprep.subr.mxu0 %v284_v53 }
 0x1a7   :  { %450 = vmatpush3.msra.mxu0 %v284_v53 }
 0x1a8   :  { %452 = vmatmul.mubr.msk.f32.vlgmr.msra.gmra.mxu0 %vm186_vm1, %v289_v54 }
 0x268   :  { %v453_v56 = vpop.f32.mrf.mxu0 }
 0x269   :  { %v380_v57 = vadd.f32 %v453_v56, %v300_v55 }
 0x26a   :  { %v374_v59 = vpop.f32.mrf.mxu0 }
 0x26b   :  { %384 = vst.msk [vmem:[%s589_s7 + $0x8] sm:$0xff] %vm56_vm0, %v380_v57  ;;  %v375_v60 = vadd.f32 %v374_v59, %v295_v58 }
 0x26d   :  { %383 = vst.msk [vmem:[%s589_s7] sm:$0xff] %vm56_vm0, %v375_v60 }

</bundles_post_ra>
